<compile_context>
chip_gen: v7x
topology: tpu7x:2x2x1
jax: 0.10.0
libtpu: 0.0.40
codegen_flags: <defaults>
</compile_context>

<pallas_src>
import functools

import numpy as np
import jax
import jax.numpy as jnp
from jax.experimental import pallas as pl
from jax.experimental.pallas import tpu as pltpu


def _round_up(x: int, m: int) -> int:
    return ((x + m - 1) // m) * m


def _build_irfft_basis(n: int, f_used: int) -> np.ndarray:
    """Fused real basis W (n, 2*f_used) s.t. irfft(X)[t] = W @ [Re(X); Im(X)] (norm='backward')."""
    t = np.arange(n, dtype=np.float64)[:, None]
    k = np.arange(f_used, dtype=np.float64)[None, :]
    ang = 2.0 * np.pi * t * k / n
    c = np.full((f_used,), 2.0, dtype=np.float64)
    c[0] = 1.0
    has_nyquist = (n % 2 == 0) and (f_used == n // 2 + 1)
    if has_nyquist:
        c[-1] = 1.0
    a = (c * np.cos(ang)) / n            # multiplies Re(X_k)
    b = (-c * np.sin(ang)) / n           # multiplies Im(X_k)
    b[:, 0] = 0.0                        # irfft ignores Im of the DC bin exactly
    if has_nyquist:
        b[:, -1] = 0.0                   # ... and of the Nyquist bin
    return np.concatenate([a, b], axis=1).astype(np.float32)     # (n, 2F)


# ---------------------------------------------------------------------------
# Kernels
# ---------------------------------------------------------------------------

def _matmul_kernel(a_ref, b_ref, o_ref):
    """Full-K tile: one MXU matmul straight to the output tile (no accumulator)."""
    o_ref[...] = jnp.dot(a_ref[...], b_ref[...],
                         preferred_element_type=jnp.float32).astype(o_ref.dtype)


def _matmul_splitk_kernel(a_ref, b_ref, o_ref, acc_ref):
    """Fallback for very large 2F: canonical (M, N, K) grid with f32 VMEM accumulator."""
    @pl.when(pl.program_id(2) == 0)
    def _init():
        acc_ref[...] = jnp.zeros_like(acc_ref)

    acc_ref[...] += jnp.dot(a_ref[...], b_ref[...],
                            preferred_element_type=jnp.float32)

    @pl.when(pl.program_id(2) == pl.num_programs(2) - 1)
    def _store():
        o_ref[...] = acc_ref[...].astype(o_ref.dtype)


def _pallas_matmul(a, b, *, tm: int, tn: int, tk: int):
    """C (m_pad, n_pad) = A (m_pad, k_pad) @ B (k_pad, n_pad), f32 output.

    All dims are pre-padded so tm | m_pad, tn | n_pad, tk | k_pad.
    """
    m_pad, k_pad = a.shape
    k_pad_b, n_pad = b.shape
    assert k_pad == k_pad_b
    itemsize = jnp.dtype(a.dtype).itemsize
    out_shape = jax.ShapeDtypeStruct((m_pad, n_pad), jnp.float32)
    grid_m, grid_n = m_pad // tm, n_pad // tn

    flops = 2 * m_pad * k_pad * n_pad
    bytes_accessed = (a.size * itemsize              # A strip resident across the N sweep
                      + b.size * itemsize * grid_m   # B streamed once per M strip
                      + m_pad * n_pad * 4)

    if tk == k_pad:
        # Collapsed-K: 2-D grid, N innermost, A strip index_map independent of j -> the W
        # strip is DMA'd once per M strip and stays VMEM-resident across the column sweep.
        working = 2 * (tm * k_pad + k_pad * tn) * itemsize + 2 * tm * tn * 4
        return pl.pallas_call(
            _matmul_kernel,
            out_shape=out_shape,
            grid_spec=pltpu.PrefetchScalarGridSpec(
                num_scalar_prefetch=0,
                grid=(grid_m, grid_n),
                in_specs=[
                    pl.BlockSpec((tm, k_pad), lambda i, j: (i, 0)),
                    pl.BlockSpec((k_pad, tn), lambda i, j: (0, j)),
                ],
                out_specs=pl.BlockSpec((tm, tn), lambda i, j: (i, j)),
            ),
            compiler_params=pltpu.CompilerParams(
                dimension_semantics=("parallel", "parallel"),
                vmem_limit_bytes=int(min(working + (4 << 20), 40 << 20))),
            cost_estimate=pl.CostEstimate(
                flops=flops, transcendentals=0, bytes_accessed=int(bytes_accessed)),
        )(a, b)

    # Split-K fallback (2F > _K_CAP).
    grid_k = k_pad // tk
    working = 2 * (tm * tk + tk * tn) * itemsize + 3 * tm * tn * 4
    return pl.pallas_call(
        _matmul_splitk_kernel,
        out_shape=out_shape,
        grid_spec=pltpu.PrefetchScalarGridSpec(
            num_scalar_prefetch=0,
            grid=(grid_m, grid_n, grid_k),
            in_specs=[
                pl.BlockSpec((tm, tk), lambda i, j, k: (i, k)),
                pl.BlockSpec((tk, tn), lambda i, j, k: (k, j)),
            ],
            out_specs=pl.BlockSpec((tm, tn), lambda i, j, k: (i, j)),
            scratch_shapes=[pltpu.VMEM((tm, tn), jnp.float32)],
        ),
        compiler_params=pltpu.CompilerParams(
            dimension_semantics=("parallel", "parallel", "arbitrary"),
            vmem_limit_bytes=int(min(working + (4 << 20), 40 << 20))),
        cost_estimate=pl.CostEstimate(
            flops=flops, transcendentals=0, bytes_accessed=int(bytes_accessed)),
    )(a, b)


_K_CAP = 2048   # largest single K block (2F) before falling back to split-K


@functools.partial(jax.jit, static_argnames=("n_time_steps", "norm", "compute_dtype"))
def irfft_pallas(inputs, n_time_steps=None, norm=None, compute_dtype=jnp.float32):
    """Pallas TPU equivalent of IRFFTModule(implementation='rfft').forward.

    inputs: complex (BATCH, FREQUENCY_MODES, SYSTEM_DIMENSIONS)
    returns: real float32 (BATCH, n_time_steps, SYSTEM_DIMENSIONS)
    """
    if norm not in (None, "backward"):
        # TODO(synk): norm='ortho'/'forward' only changes the 1/n scaling baked into W.
        raise NotImplementedError("only norm=None ('backward') is supported")

    batch, n_freq, n_dim = inputs.shape
    n = int(n_time_steps) if n_time_steps is not None else 2 * (n_freq - 1)
    if n <= 0:
        raise ValueError(f"invalid output length n={n}; need n_time_steps >= 1")
    f_used = min(n_freq, n // 2 + 1)        # torch.fft.irfft truncates extra bins

    x = inputs[:, :f_used, :]
    xr = jnp.real(x).astype(compute_dtype)  # cast BEFORE padding: halves padded-copy traffic
    xi = jnp.imag(x).astype(compute_dtype)

    n_cols = batch * n_dim
    k_dim = 2 * f_used
    m_align = 16 if jnp.dtype(compute_dtype).itemsize == 2 else 8
    if k_dim > _K_CAP:
        tk = _K_CAP
        k_pad = _round_up(k_dim, tk)
    else:
        k_pad = _round_up(k_dim, 128)
        tk = k_pad

    w = _build_irfft_basis(n, f_used)       # (n, 2F) f32, trace-time constant

    if n_cols >= 128:
        # ---- column-major form: out (n, B*D) = W (n, 2F) @ [Re; Im] (2F, B*D) ----
        xs = jnp.transpose(jnp.concatenate([xr, xi], axis=1), (1, 0, 2))
        xs = xs.reshape(k_dim, n_cols)                            # (2F, B*D)

        tm = min(256, _round_up(n, m_align))
        tn = min(512, _round_up(n_cols, 128))
        m_pad = _round_up(n, tm)
        n_pad = _round_up(n_cols, tn)
        # v7x megacore: make sure the parallel grid has >= 2 iterations when possible.
        if (m_pad // tm) * (n_pad // tn) == 1:
            tm_half = _round_up((n + 1) // 2, m_align)
            if tm_half < tm:
                tm = tm_half
                m_pad = _round_up(n, tm)

        w_p = np.zeros((m_pad, k_pad), np.float32)
        w_p[:n, :k_dim] = w
        w_p = jnp.asarray(w_p, dtype=compute_dtype)               # padded constant, no XLA pad
        x_p = jnp.pad(xs, ((0, k_pad - k_dim), (0, n_pad - n_cols)))

        out_p = _pallas_matmul(w_p, x_p, tm=tm, tn=tn, tk=tk)     # (m_pad, n_pad) f32
        out = out_p[:n, :n_cols].reshape(n, batch, n_dim)
        return jnp.transpose(out, (1, 0, 2))

    # ---- transposed form (B*D < 128): out^T (B*D, n) = [Re|Im] (B*D, 2F) @ W^T (2F, n) ----
    # Long time axis sits on the lane dimension -> lane-dense output, no MXU padding waste.
    xrow = jnp.concatenate(
        [jnp.transpose(xr, (0, 2, 1)).reshape(n_cols, f_used),
         jnp.transpose(xi, (0, 2, 1)).reshape(n_cols, f_used)], axis=1)   # (B*D, 2F)

    r_pad = _round_up(n_cols, m_align)
    tn = min(512, _round_up(n, 128))
    n_pad = _round_up(n, tn)
    # v7x megacore: split the single lane tile in two if it is large enough.
    if n_pad // tn == 1 and n_pad >= 256 and (n_pad // 2) % 128 == 0:
        tn = n_pad // 2

    wt_p = np.zeros((k_pad, n_pad), np.float32)
    wt_p[:k_dim, :n] = w.T
    wt_p = jnp.asarray(wt_p, dtype=compute_dtype)
    x_p = jnp.pad(xrow, ((0, r_pad - n_cols), (0, k_pad - k_dim)))

    out_t = _pallas_matmul(x_p, wt_p, tm=r_pad, tn=tn, tk=tk)     # (r_pad, n_pad) f32
    out = out_t[:n_cols, :n].reshape(batch, n_dim, n)
    # TODO(synk): the torch module's default dtype is cfloat; cast with out.astype(jnp.complex64)
    # if exact complex-output parity is required — the real float32 result is returned here.
    return jnp.transpose(out, (0, 2, 1))


if __name__ == "__main__":
    key = jax.random.PRNGKey(0)

    # Small-batch shape (exercises the transposed, lane-dense path).
    batch, n_time, n_dim = 2, 16, 4
    n_freq = n_time // 2 + 1                       # 9 one-sided frequency modes
    kr, ki = jax.random.split(key)
    x_small = (jax.random.normal(kr, (batch, n_freq, n_dim), jnp.float32)
               + 1j * jax.random.normal(ki, (batch, n_freq, n_dim), jnp.float32)
               ).astype(jnp.complex64)

    out = jax.block_until_ready(irfft_pallas(x_small, n_time_steps=n_time, norm=None))
    ref = jnp.fft.irfft(x_small, n=n_time, axis=1, norm="backward")
    assert out.shape == (batch, n_time, n_dim), out.shape
    err = float(jnp.max(jnp.abs(out - ref)))
    assert err < 5e-4, f"transposed path max abs error too large: {err}"

    # Larger-column shape (exercises the column-major path, B*D >= 128).
    batch2, n_time2, n_dim2 = 16, 32, 8
    n_freq2 = n_time2 // 2 + 1
    kr2, ki2 = jax.random.split(ki)
    x_big = (jax.random.normal(kr2, (batch2, n_freq2, n_dim2), jnp.float32)
             + 1j * jax.random.normal(ki2, (batch2, n_freq2, n_dim2), jnp.float32)
             ).astype(jnp.complex64)

    out2 = jax.block_until_ready(irfft_pallas(x_big, n_time_steps=n_time2, norm=None))
    ref2 = jnp.fft.irfft(x_big, n=n_time2, axis=1, norm="backward")
    assert out2.shape == (batch2, n_time2, n_dim2), out2.shape
    err2 = float(jnp.max(jnp.abs(out2 - ref2)))
    assert err2 < 5e-4, f"column-major path max abs error too large: {err2}"

    print("KERNEL_OK")
</pallas_src>

<mosaic_0001>
module attributes {stable_mosaic.version = 11 : i64} {
  func.func @_matmul_kernel(%arg0: i32, %arg1: i32, %arg2: memref<8x128xf32, #tpu.memory_space<vmem>>, %arg3: memref<128x128xf32, #tpu.memory_space<vmem>>, %arg4: memref<8x128xf32, #tpu.memory_space<vmem>>) attributes {dimension_semantics = [#tpu.dimension_semantics<parallel>, #tpu.dimension_semantics<parallel>], iteration_bounds = array<i64: 1, 1>, scalar_prefetch = 0 : i64, scratch_operands = 0 : i64, tpu.core_type = #tpu.core_type<tc>, window_params = [{transform_indices = @transform_0, window_bounds = array<i64: 8, 128>}, {transform_indices = @transform_1, window_bounds = array<i64: 128, 128>}, {transform_indices = @transform_2, window_bounds = array<i64: 8, 128>}]} {
    %c0 = arith.constant 0 : index
    %c0_0 = arith.constant 0 : index
    %0 = vector.load %arg2[%c0, %c0_0] : memref<8x128xf32, #tpu.memory_space<vmem>>, vector<8x128xf32>
    %c0_1 = arith.constant 0 : index
    %c0_2 = arith.constant 0 : index
    %1 = vector.load %arg3[%c0_1, %c0_2] : memref<128x128xf32, #tpu.memory_space<vmem>>, vector<128x128xf32>
    %cst = arith.constant dense<0.000000e+00> : vector<8x128xf32>
    %2 = tpu.matmul %0, %1, %cst {dimension_numbers = #tpu.dot_dimension_numbers<[1], [0], [0], [1], [0, 0, 1, 1], [], []>} : vector<8x128xf32>, vector<128x128xf32>, vector<8x128xf32> -> vector<8x128xf32>
    %c0_3 = arith.constant 0 : index
    %c0_4 = arith.constant 0 : index
    %3 = vector.load %arg4[%c0_3, %c0_4] : memref<8x128xf32, #tpu.memory_space<vmem>>, vector<8x128xf32>
    tpu.vector_store %arg4[%c0_3, %c0_4], %2 {strides = array<i32>} : memref<8x128xf32, #tpu.memory_space<vmem>>, vector<8x128xf32>,
    return
  }
  func.func @transform_0(%arg0: i32, %arg1: i32) -> (i32, i32) {
    %c0_i32 = arith.constant 0 : i32
    %c0_i32_0 = arith.constant 0 : i32
    return %arg0, %c0_i32 : i32, i32
  }
  func.func @transform_1(%arg0: i32, %arg1: i32) -> (i32, i32) {
    %c0_i32 = arith.constant 0 : i32
    %c0_i32_0 = arith.constant 0 : i32
    return %c0_i32, %arg1 : i32, i32
  }
  func.func @transform_2(%arg0: i32, %arg1: i32) -> (i32, i32) {
    %c0_i32 = arith.constant 0 : i32
    return %arg0, %arg1 : i32, i32
  }
}

</mosaic_0001>

<bundles_post_ra>
// kernel: custom-call.1
= control target key start
LH: loop header
LB: loop body
LE: loop exit
PB: predicated region body
PF: predicated region fallthrough
CT: control target
= control target key end

     0   :  { %s59_s0 = inlined_call_operand.hbm [shape: c64[2,9,4], index: 0, kind: input, shape index: {}]   ;;  %s60_s1 = inlined_call_operand.vmem [shape: f32[2,9,4], index: 1, kind: output, shape index: {}]  }
   0x1   :  { %s2_s8 = scalar_lea.hbm %s59_s0, 128 }
   0x2   :  { %3 = vsyncpa [#allocation0], 0  ;;  %s4_s11 = sshll.u32 %s60_s1, 4  ;;  %s34_s14 = scalar_lea.hbm %s59_s0, 256  ;;  %s5_s11 = int_to_ptr.vmem [resolvable:$true] %s4_s11 }
   0x3   :  { %p11_p0 = scmp.ne.s32.totalorder %s2_s8, %s34_s14  ;;  %p13_p1 = scmp.lt.u32.totalorder %s2_s8, %s59_s0 }
   0x4   :  { %p14_p2 = scmp.lt.u32.totalorder %s34_s14, %s34_s14  ;;  %p16_p4 = scmp.lt.u32.totalorder %s34_s14, %s2_s8 }
   0x6   :  { %p15_p3 = por %p14_p2, %p13_p1 }
   0x8   :  { %p17_p5 = por %p16_p4, %p15_p3 }
   0xa   :  { %p18_p6 = pnand %p17_p5, %p11_p0 }
   0xc   :  { %21 = shalt.err (!%p18_p6)  }
   0xd   :  { %s22_s17 = scalar_lea.vmem %s5_s11, 128  ;;  %p27_p8 = scmp.lt.s32.totalorder %s5_s11, %s5_s11 }
   0xe   :  { %p23_p7 = scmp.ne.s32.totalorder %s5_s11, %s22_s17  ;;  %p28_p9 = scmp.lt.s32.totalorder %s22_s17, %s22_s17 }
  0x10   :  { %p29_p10 = por %p28_p9, %p27_p8 }
  0x12   :  { %p30_p11 = pnand %p29_p10, %p23_p7 }
  0x14   :  { %33 = shalt.err (!%p30_p11)  }
  0x15   :  { %7 = dma.hbm_to_vmem [thread:$0]  %s2_s8, 128, %s5_s11, [#allocation0] }
  0x16   :  { %35 = dma.done.wait [#allocation0], 128  }
  0x17   :  { %36 = vsyncadd [#allocation0], 4294967168 }
  0x18   :  { %9 = vsyncpa [#allocation0], 1 }

// kernel: custom-call
= control target key start
LH: loop header
LB: loop body
LE: loop exit
PB: predicated region body
PF: predicated region fallthrough
CT: control target
= control target key end

     0   :  { %2 = vsyncpa [#allocation0], 0  ;;  %s61_s0 = inlined_call_operand.hbm [shape: c64[2,9,4], index: 0, kind: input, shape index: {}]   ;;  %s62_s1 = inlined_call_operand.vmem [shape: f32[2,9,4], index: 1, kind: output, shape index: {}]  }
   0x1   :  { %s3_s8 = sshll.u32 %s62_s1, 4  ;;  %s9_s11 = scalar_lea.hbm %s61_s0, 128  ;;  %s4_s8 = int_to_ptr.vmem [resolvable:$true] %s3_s8 }
   0x2   :  { %p10_p0 = scmp.ne.s32.totalorder %s61_s0, %s9_s11  ;;  %s11_s16 = scalar_lea.hbm %s61_s0, 256 }
   0x3   :  { %p12_p1 = scmp.lt.u32.totalorder %s11_s16, %s9_s11  ;;  %p13_p2 = scmp.lt.u32.totalorder %s9_s11, %s61_s0 }
   0x5   :  { %p14_p3 = por %p13_p2, %p12_p1 }
   0x7   :  { %p15_p4 = pnand %p14_p3, %p10_p0 }
   0x9   :  { %18 = shalt.err (!%p15_p4)  }
   0xa   :  { %s19_s1 = scalar_lea.vmem %s4_s8, 128  ;;  %p24_p6 = scmp.lt.s32.totalorder %s4_s8, %s4_s8 }
   0xb   :  { %p20_p5 = scmp.ne.s32.totalorder %s4_s8, %s19_s1  ;;  %p25_p7 = scmp.lt.s32.totalorder %s19_s1, %s19_s1 }
   0xd   :  { %p26_p8 = por %p25_p7, %p24_p6 }
   0xf   :  { %p27_p9 = pnand %p26_p8, %p20_p5 }
  0x11   :  { %30 = shalt.err (!%p27_p9)  }
  0x12   :  { %6 = dma.hbm_to_vmem [thread:$0]  %s61_s0, 128, %s4_s8, [#allocation0] }
  0x13   :  { %31 = dma.done.wait [#allocation0], 128  }
  0x14   :  { %32 = vsyncadd [#allocation0], 4294967168 }
  0x15   :  { %8 = vsyncpa [#allocation0], 1 }

// kernel: irfft_pallas.1
= control target key start
LH: loop header
LB: loop body
LE: loop exit
PB: predicated region body
PF: predicated region fallthrough
CT: control target
= control target key end

     0   :  { %7 = vsyncpa [#allocation3], 0  ;;  %s309_s0 = inlined_call_operand.vmem [shape: f32[8,128], index: 0, kind: input, shape index: {}]   ;;  %s310_s1 = inlined_call_operand.hbm [shape: f32[128,128], index: 1, kind: input, shape index: {}]   ;;  %s311_s2 = inlined_call_operand.hbm [shape: f32[8,128], index: 2, kind: output, shape index: {}]  }
   0x1   :  { %8 = vsyncpa [#allocation4], 0  ;;  %s260_s9 = smov [#allocation2]   ;;  %s212_s13 = scalar_lea.hbm %s310_s1, 2048 }
   0x2   :  { %s16_s10 = sshll.u32 %s260_s9, 4  ;;  %p213_p0 = scmp.ne.s32.totalorder %s310_s1, %s212_s13  ;;  %s17_s10 = int_to_ptr.vmem [resolvable:$true] %s16_s10 }
   0x3   :  { %p216_p1 = scmp.lt.u32.totalorder %s212_s13, %s310_s1 }
   0x5   :  { %p218_p2 = pnand %p216_p1, %p213_p0 }
   0x7   :  { %221 = shalt.err (!%p218_p2)
}
   0x8   :  { %s222_s18 = scalar_lea.vmem %s17_s10, 2048  ;;  %p227_p4 = scmp.lt.s32.totalorder %s17_s10, %s17_s10 }
   0x9   :  { %p223_p3 = scmp.ne.s32.totalorder %s17_s10, %s222_s18  ;;  %p228_p5 = scmp.lt.s32.totalorder %s222_s18, %s222_s18 }
   0xb   :  { %p229_p6 = por %p228_p5, %p227_p4 }
   0xd   :  { %p230_p7 = pnand %p229_p6, %p223_p3 }
   0xf   :  { %233 = shalt.err (!%p230_p7)
}
  0x10   :  { %s261_s19 = smov 128   ;;  %s262_s20 = smov 8  }
  0x11   :  { %22 = dma.hbm_to_vmem [thread:$0]  %s310_s1, 2048, %s17_s10, [#allocation3], %s261_s19, %s261_s19, %s262_s20  }
  0x12   :  { %256 = dma.done.wait [#allocation3], 2048  }
  0x13   :  { %257 = vsyncadd [#allocation3], 4294965248  ;;  %v263_v0 = vmov 0.0|0.0   ;;  %vm264_vm0 = vmmov 0   ;;  %v265_v1 = vmov 0.0   ;;  %v27_v2 = vld [vmem:[#allocation2] sm:$0xff] }
  0x14   :  { %181 = vmatprep.subr.bf16.mxu0 %v263_v0  ;;  %178 = vmatprep.mubr.msk.f32.mxu0 %vm264_vm0, %v265_v1  ;;  %v28_v3 = vld [vmem:[#allocation2 + $0x8] sm:$0xff]  ;;  %v29_v4 = vld [vmem:[#allocation2 + $0x10] sm:$0xff]  ;;  %v30_v6 = vld [vmem:[#allocation2 + $0x18] sm:$0xff]  ;;  %s266_s24 = smov [#allocation5]  }
  0x15   :  { %v182_v5 = vpack.c.bf16 %v28_v3, %v27_v2  ;;  %v185_v7 = vpack.c.bf16 %v30_v6, %v29_v4  ;;  %v31_v8 = vld [vmem:[#allocation2 + $0x20] sm:$0xff]  ;;  %v32_v9 = vld [vmem:[#allocation2 + $0x28] sm:$0xff]  ;;  %v33_v11 = vld [vmem:[#allocation2 + $0x30] sm:$0xff]  ;;  %s120_s25 = sshll.u32 %s266_s24, 4  ;;  %s121_s25 = int_to_ptr.vmem [resolvable:$true] %s120_s25 }
  0x16   :  { %v188_v10 = vpack.c.bf16 %v32_v9, %v31_v8  ;;  %v34_v12 = vld [vmem:[#allocation2 + $0x38] sm:$0xff]  ;;  %v35_v14 = vld [vmem:[#allocation2 + $0x40] sm:$0xff]  ;;  %v36_v15 = vld [vmem:[#allocation2 + $0x48] sm:$0xff]  ;;  %s234_s26 = scalar_lea.vmem %s121_s25, 128  ;;  %p239_p9 = scmp.lt.s32.totalorder %s121_s25, %s121_s25 }
  0x17   :  { %183 = vmatpush3.bf16.msra.mxu0 %v182_v5  ;;  %v191_v13 = vpack.c.bf16 %v34_v12, %v33_v11  ;;  %v194_v16 = vpack.c.bf16 %v36_v15, %v35_v14  ;;  %v37_v17 = vld [vmem:[#allocation2 + $0x50] sm:$0xff]  ;;  %v38_v18 = vld [vmem:[#allocation2 + $0x58] sm:$0xff]  ;;  %v39_v20 = vld [vmem:[#allocation2 + $0x60] sm:$0xff]  ;;  %p235_p8 = scmp.ne.s32.totalorder %s121_s25, %s234_s26  ;;  %p240_p10 = scmp.lt.s32.totalorder %s234_s26, %s234_s26 }
  0x18   :  { %184 = vmatprep.subr.bf16.mxu0 %v263_v0  ;;  %v197_v19 = vpack.c.bf16 %v38_v18, %v37_v17  ;;  %v40_v21 = vld [vmem:[#allocation2 + $0x68] sm:$0xff]  ;;  %v41_v23 = vld [vmem:[#allocation2 + $0x70] sm:$0xff]  ;;  %v42_v24 = vld [vmem:[#allocation2 + $0x78] sm:$0xff] }
  0x19   :  { %v200_v22 = vpack.c.bf16 %v40_v21, %v39_v20  ;;  %v203_v25 = vpack.c.bf16 %v42_v24, %v41_v23  ;;  %v26_v26 = vld [vmem:[%s309_s0] sm:$0xff]  ;;  %p241_p11 = por %p240_p10, %p239_p9 }
  0x1b   :  { %186 = vmatpush3.bf16.msra.mxu0 %v185_v7  ;;  %p242_p12 = pnand %p241_p11, %p235_p8 }
  0x1c   :  { %187 = vmatprep.subr.bf16.mxu0 %v263_v0 }
  0x1f   :  { %189 = vmatpush3.bf16.msra.mxu0 %v188_v10 }
  0x20   :  { %190 = vmatprep.subr.bf16.mxu0 %v263_v0 }
  0x23   :  { %192 = vmatpush3.bf16.msra.mxu0 %v191_v13 }
  0x24   :  { %193 = vmatprep.subr.bf16.mxu0 %v263_v0 }
  0x27   :  { %195 = vmatpush3.bf16.msra.mxu0 %v194_v16 }
  0x28   :  { %196 = vmatprep.subr.bf16.mxu0 %v263_v0 }
  0x2b   :  { %198 = vmatpush3.bf16.msra.mxu0 %v197_v19 }
  0x2c   :  { %199 = vmatprep.subr.bf16.mxu0 %v263_v0 }
  0x2f   :  { %201 = vmatpush3.bf16.msra.mxu0 %v200_v22 }
  0x30   :  { %202 = vmatprep.subr.bf16.mxu0 %v263_v0 }
  0x33   :  { %204 = vmatpush3.bf16.msra.mxu0 %v203_v25 }
  0x36   :  { %179 = vmatmul.mubr.f32.vlgmr.msra.gmra.mrb[0].mxu0 %v26_v26 }
 0x109   :  { %v109_v27 = vpop.f32.mrb[0].mxu0 }
 0x10a   :  { %113 = vst [vmem:[#allocation5] sm:$0xff] %v109_v27  ;;  %v180_v28 = vpop.f32.mrb[1].mxu0 }
 0x10b   :  { %245 = shalt.err (!%p242_p12)
}
 0x10c   :  { %s246_s29 = scalar_lea.hbm %s311_s2, 128 }
 0x10d   :  { %p247_p13 = scmp.ne.s32.totalorder %s311_s2, %s246_s29  ;;  %p250_p0 = scmp.lt.u32.totalorder %s246_s29, %s311_s2 }
 0x10f   :  { %p252_p1 = pnand %p250_p0, %p247_p13 }
 0x111   :  { %255 = shalt.err (!%p252_p1)
}
 0x112   :  { %123 = dma.vmem_to_hbm [thread:$0]  %s121_s25, 128, %s311_s2, [#allocation4]  }
 0x113   :  { %258 = dma.done.wait [#allocation4], 128  }
 0x114   :  { %259 = vsyncadd [#allocation4], 4294967168 }
 0x115   :  { %127 = vsyncpa [#allocation3], 1 }
 0x116   :  { %128 = vsyncpa [#allocation4], 1 }

</bundles_post_ra>
